<compile_context>
chip_gen: v7x
topology: tpu7x:2x2x1
jax: 0.10.0
libtpu: 0.0.40
codegen_flags: <defaults>
</compile_context>

<pallas_src>
import functools

import numpy as np
import jax
import jax.numpy as jnp
from jax.experimental import pallas as pl
from jax.experimental.pallas import tpu as pltpu


# ---------------------------------------------------------------------------
# Kernels
# ---------------------------------------------------------------------------
def _pad_copy_kernel(x_ref, o_ref, *, in_channels):
    """stride == 1: channel zero-pad as two slab stores (no per-batch loop).

    x_ref: (n_tile, in_channels,  H*W)
    o_ref: (n_tile, out_channels, H*W)
    """
    n_tile, out_channels, hw = o_ref.shape
    o_ref[:, :in_channels, :] = x_ref[...]
    add = out_channels - in_channels
    if add > 0:
        o_ref[:, in_channels:, :] = jnp.zeros((n_tile, add, hw), o_ref.dtype)


def _pad_pool_kernel(x_ref, p_ref, o_ref, *, in_channels):
    """stride == 2: channel zero-pad + 2x2 avg pool (ceil_mode=True).

    The 2x2 window sum AND the ceil_mode divisor are folded into the constant
    matrix P (He*We, Ho*Wo), resident in VMEM. The whole batch tile is pooled
    with a single (n_tile*C, He*We) x (He*We, Ho*Wo) matmul.

    x_ref: (n_tile, in_channels,  He*We)
    p_ref: (He*We, Ho*Wo)
    o_ref: (n_tile, out_channels, Ho*Wo)
    """
    n_tile, c, hewe = x_ref.shape
    _, out_channels, howo = o_ref.shape
    x2d = x_ref[...].reshape(n_tile * c, hewe)
    pooled = jnp.dot(x2d, p_ref[...], preferred_element_type=jnp.float32)
    o_ref[:, :in_channels, :] = pooled.reshape(n_tile, c, howo).astype(o_ref.dtype)
    add = out_channels - in_channels
    if add > 0:
        o_ref[:, in_channels:, :] = jnp.zeros((n_tile, add, howo), o_ref.dtype)


# ---------------------------------------------------------------------------
# Host-side helpers
# ---------------------------------------------------------------------------
@functools.lru_cache(maxsize=None)
def _pool_matrix_np(h, w):
    """P[hw, j] = 1/divisor(j) if flat (padded) spatial index hw lies in output
    window j; divisor matches AvgPool2d(2, 2, ceil_mode=True, padding=0)."""
    ho, wo = -(-h // 2), -(-w // 2)
    he, we = 2 * ho, 2 * wo
    win = (np.arange(he)[:, None] // 2) * wo + (np.arange(we)[None, :] // 2)
    win = win.reshape(he * we)
    cnt_h = np.minimum(2, h - 2 * np.arange(ho)).astype(np.float64)
    cnt_w = np.minimum(2, w - 2 * np.arange(wo)).astype(np.float64)
    inv = (1.0 / (cnt_h[:, None] * cnt_w[None, :])).reshape(ho * wo)
    p = (win[:, None] == np.arange(ho * wo)[None, :]).astype(np.float64)
    return np.asarray(p * inv[None, :], dtype=np.float32)


def _device_kind():
    try:
        return jax.devices()[0].device_kind.lower()
    except Exception:
        return ""


def _vmem_budget(kind):
    """(usable VMEM budget for our blocks, whether to set an explicit limit)."""
    if "v7" in kind:
        return 40 << 20, True        # 64 MiB physical on v7x -> stay well under
    if any(g in kind for g in ("v4", "v5", "v6")):
        return 80 << 20, True        # 128 MiB physical
    return 12 << 20, False           # unknown chip: stay under default scoped limit


def _is_multi_core(kind):
    """Chips whose 'parallel' grid axes are sharded across 2 TensorCores."""
    if any(g in kind for g in ("v5 lite", "v5e", "v6 lite", "v6e")):
        return False                 # single TensorCore per chip
    return True                      # v4 / v5p / v7x / unknown: keep >=2 steps


def _plan_tiles(n, io_bytes_per_batch, vmem_bytes_per_batch, fixed_vmem_bytes,
                kind, traffic_target=8 << 20):
    """Pick the batch tile (HBM-bound -> big blocks) and a VMEM limit."""
    budget, set_limit = _vmem_budget(kind)
    headroom = 4 << 20
    by_traffic = max(1, traffic_target // max(io_bytes_per_batch, 1))
    by_vmem = max(1, (budget - fixed_vmem_bytes - headroom)
                  // max(vmem_bytes_per_batch, 1))
    t = int(max(1, min(n, by_traffic, by_vmem)))
    if _is_multi_core(kind) and n >= 2:
        t = min(t, -(-n // 2))       # keep at least 2 grid steps for megacore
    vmem_limit = None
    if set_limit:
        need = fixed_vmem_bytes + t * vmem_bytes_per_batch + headroom
        vmem_limit = int(max(min(need, budget), 32 << 20))
    return t, vmem_limit


# ---------------------------------------------------------------------------
# Public wrapper
# ---------------------------------------------------------------------------
def identity_padding(x, in_channels, out_channels, stride=1):
    """Pallas implementation of IdentityPadding.forward. x is NCHW."""
    N, C, H, W = x.shape
    assert C == in_channels
    assert out_channels >= in_channels
    itemsize = jnp.dtype(x.dtype).itemsize
    kind = _device_kind()

    if stride == 1:
        HW = H * W
        xf = x.reshape(N, C, HW)                       # free contiguous reshape
        io_per_batch = (in_channels + out_channels) * HW * itemsize
        vmem_per_batch = 2 * io_per_batch              # double-buffered in + out
        n_tile, vmem_limit = _plan_tiles(N, io_per_batch, vmem_per_batch,
                                         1 << 20, kind)
        grid = (pl.cdiv(N, n_tile),)
        out = pl.pallas_call(
            functools.partial(_pad_copy_kernel, in_channels=in_channels),
            out_shape=jax.ShapeDtypeStruct((N, out_channels, HW), x.dtype),
            grid=grid,
            in_specs=[pl.BlockSpec((n_tile, in_channels, HW),
                                   lambda g: (g, 0, 0))],
            out_specs=pl.BlockSpec((n_tile, out_channels, HW),
                                   lambda g: (g, 0, 0)),
            compiler_params=pltpu.CompilerParams(
                dimension_semantics=("parallel",),
                vmem_limit_bytes=vmem_limit),
        )(xf)
        return out.reshape(N, out_channels, H, W)

    assert stride == 2
    Ho, Wo = -(-H // 2), -(-W // 2)                    # ceil_mode output size
    He, We = 2 * Ho, 2 * Wo
    if (He, We) != (H, W):
        # Zero-pad H/W to even; the ceil_mode divisor is folded into P.
        x = jnp.pad(x, ((0, 0), (0, 0), (0, He - H), (0, We - W)))
    HeWe, HoWo = He * We, Ho * Wo
    xf = x.reshape(N, C, HeWe)                         # free contiguous reshape

    # Keep bf16 activations on the native-rate MXU path; f32 stays f32.
    p_dtype = x.dtype if x.dtype == jnp.bfloat16 else jnp.float32
    pmat = jnp.asarray(_pool_matrix_np(H, W), dtype=p_dtype)
    p_bytes = HeWe * HoWo * jnp.dtype(p_dtype).itemsize

    io_per_batch = (in_channels * HeWe + out_channels * HoWo) * itemsize
    # double-buffered in/out + f32 matmul intermediates per batch element
    vmem_per_batch = 2 * io_per_batch + in_channels * (HeWe + HoWo) * 4
    n_tile, vmem_limit = _plan_tiles(N, io_per_batch, vmem_per_batch,
                                     2 * p_bytes + (1 << 20), kind)
    grid = (pl.cdiv(N, n_tile),)
    out = pl.pallas_call(
        functools.partial(_pad_pool_kernel, in_channels=in_channels),
        out_shape=jax.ShapeDtypeStruct((N, out_channels, HoWo), x.dtype),
        grid=grid,
        in_specs=[pl.BlockSpec((n_tile, in_channels, HeWe),
                               lambda g: (g, 0, 0)),
                  pl.BlockSpec((HeWe, HoWo), lambda g: (0, 0))],   # resident P
        out_specs=pl.BlockSpec((n_tile, out_channels, HoWo),
                               lambda g: (g, 0, 0)),
        compiler_params=pltpu.CompilerParams(
            dimension_semantics=("parallel",),
            vmem_limit_bytes=vmem_limit),
    )(xf, pmat)
    return out.reshape(N, out_channels, Ho, Wo)


# ---------------------------------------------------------------------------
# Pure-JAX reference mirroring the PyTorch forward
# ---------------------------------------------------------------------------
def _reference(x, in_channels, out_channels, stride):
    N, C, H, W = x.shape
    out = jnp.pad(x, ((0, 0), (0, out_channels - in_channels), (0, 0), (0, 0)))
    if stride == 2:
        Ho, Wo = -(-H // 2), -(-W // 2)
        padded = jnp.pad(out, ((0, 0), (0, 0), (0, 2 * Ho - H), (0, 2 * Wo - W)))
        s = padded.reshape(N, out_channels, Ho, 2, Wo, 2).sum(axis=(3, 5))
        cnt_h = jnp.minimum(2, H - 2 * jnp.arange(Ho)).astype(x.dtype)
        cnt_w = jnp.minimum(2, W - 2 * jnp.arange(Wo)).astype(x.dtype)
        out = s / (cnt_h[:, None] * cnt_w[None, :])
    return out


if __name__ == "__main__":
    key = jax.random.PRNGKey(0)
    N, in_channels, out_channels, H, W = 2, 4, 8, 16, 16
    x = jax.random.normal(key, (N, in_channels, H, W), dtype=jnp.float32)

    # stride = 1 path (pure channel zero-padding)
    y1 = jax.block_until_ready(identity_padding(x, in_channels, out_channels, 1))
    ref1 = _reference(x, in_channels, out_channels, 1)
    assert y1.shape == (N, out_channels, H, W)
    assert jnp.allclose(y1, ref1, atol=1e-6), "stride=1 mismatch"

    # stride = 2 path (channel zero-padding + 2x2 avg pool, ceil_mode=True)
    y2 = jax.block_until_ready(identity_padding(x, in_channels, out_channels, 2))
    ref2 = _reference(x, in_channels, out_channels, 2)
    assert y2.shape == (N, out_channels, H // 2, W // 2)
    assert jnp.allclose(y2, ref2, atol=1e-5), "stride=2 mismatch"

    # stride = 2 with odd spatial size (exercises ceil_mode clipped divisors)
    key2 = jax.random.PRNGKey(1)
    x3 = jax.random.normal(key2, (2, 3, 7, 7), dtype=jnp.float32)
    y3 = jax.block_until_ready(identity_padding(x3, 3, 6, 2))
    ref3 = _reference(x3, 3, 6, 2)
    assert y3.shape == (2, 6, 4, 4)
    assert jnp.allclose(y3, ref3, atol=1e-5), "stride=2 odd-spatial mismatch"

    print("KERNEL_OK")
</pallas_src>

<mosaic_0001>
module attributes {stable_mosaic.version = 11 : i64} {
  func.func @_pad_copy_kernel(%arg0: i32, %arg1: memref<1x4x256xf32, #tpu.memory_space<vmem>>, %arg2: memref<1x8x256xf32, #tpu.memory_space<vmem>>) attributes {dimension_semantics = [#tpu.dimension_semantics<parallel>], iteration_bounds = array<i64: 2>, scalar_prefetch = 0 : i64, scratch_operands = 0 : i64, tpu.core_type = #tpu.core_type<tc>, window_params = [{transform_indices = @transform_0, window_bounds = array<i64: 1, 4, 256>}, {transform_indices = @transform_1, window_bounds = array<i64: 1, 8, 256>}]} {
    %c0 = arith.constant 0 : index
    %c0_0 = arith.constant 0 : index
    %c0_1 = arith.constant 0 : index
    %0 = vector.load %arg1[%c0, %c0_0, %c0_1] : memref<1x4x256xf32, #tpu.memory_space<vmem>>, vector<1x4x256xf32>
    %c0_2 = arith.constant 0 : index
    %c0_3 = arith.constant 0 : index
    %c0_4 = arith.constant 0 : index
    %1 = vector.load %arg2[%c0_2, %c0_3, %c0_4] : memref<1x8x256xf32, #tpu.memory_space<vmem>>, vector<1x4x256xf32>
    tpu.vector_store %arg2[%c0_2, %c0_3, %c0_4], %0 {strides = array<i32>} : memref<1x8x256xf32, #tpu.memory_space<vmem>>, vector<1x4x256xf32>,
    %cst = arith.constant 0.000000e+00 : f32
    %2 = vector.broadcast %cst : f32 to vector<1x4x256xf32>
    %c0_5 = arith.constant 0 : index
    %c4 = arith.constant 4 : index
    %c0_6 = arith.constant 0 : index
    %3 = vector.load %arg2[%c0_5, %c4, %c0_6] : memref<1x8x256xf32, #tpu.memory_space<vmem>>, vector<1x4x256xf32>
    tpu.vector_store %arg2[%c0_5, %c4, %c0_6], %2 {strides = array<i32>} : memref<1x8x256xf32, #tpu.memory_space<vmem>>, vector<1x4x256xf32>,
    return
  }
  func.func @transform_0(%arg0: i32) -> (i32, i32, i32) {
    %c0_i32 = arith.constant 0 : i32
    %c0_i32_0 = arith.constant 0 : i32
    %c0_i32_1 = arith.constant 0 : i32
    return %arg0, %c0_i32, %c0_i32_0 : i32, i32, i32
  }
  func.func @transform_1(%arg0: i32) -> (i32, i32, i32) {
    %c0_i32 = arith.constant 0 : i32
    %c0_i32_0 = arith.constant 0 : i32
    %c0_i32_1 = arith.constant 0 : i32
    return %arg0, %c0_i32, %c0_i32_0 : i32, i32, i32
  }
}

</mosaic_0001>

<bundles_post_ra>
// kernel: tpu_custom_call.1
= control target key start
LH: loop header
LB: loop body
LE: loop exit
PB: predicated region body
PF: predicated region fallthrough
CT: control target
= control target key end

     0   :  { %6 = vsyncpa [#allocation3], 0  ;;  %s563_s0 = inlined_call_operand.hbm [shape: f32[2,4,256], index: 0, kind: input, shape index: {}]   ;;  %s564_s1 = inlined_call_operand.hbm [shape: f32[2,8,256], index: 1, kind: output, shape index: {}]  }
   0x1   :  { %8 = vsyncpa [#allocation3 + $0x1], 0 }
   0x2   :  { %9 = vsyncpa [#allocation4], 0 }
   0x3   :  { %11 = vsyncpa [#allocation4 + $0x1], 0  ;;  %s401_s6 = smov 0   ;;  %s403_s7 = smov 0  }
   0x4   :  { %s405_s8 = smov 0   ;;  %s407_s9 = smov 0  }
   0x5 LB: > { %s422_s10 = sadd.s32 4294967295, %s386_s9   ;;  %s226_s11 = sadd.s32 4294967294, %s386_s9   ;;  %s386_s9 = sphi %s407_s9, %s579_s9   ;;  %s382_s8 = sphi %s405_s8, %s578_s8   ;;  %s378_s7 = sphi %s403_s7, %s577_s7   ;;  %s374_s6 = sphi %s401_s6, %s576_s6  }
   0x6   : > { %s426_s12 = sadd.s32 1, %s386_s9   ;;  %s24_s13 = sadd.s32 1, %s382_s8 }
   0x7   : > { %s21_s14 = ssub.s32 %s386_s9, %s426_s12  ;;  %p31_p0 = scmp.ne.s32.totalorder %s382_s8, %s378_s7 }
   0x8   : > { %p22_p1 = scmp.eq.s32.totalorder %s21_s14, 0  ;;  %p32_p2 = scmp.eq.s32.totalorder %s386_s9, 0 }
   0x9   : > { %p37_p3 = scmp.ne.s32.totalorder %s378_s7, %s374_s6  ;;  %p38_p4 = scmp.eq.s32.totalorder %s422_s10, 0 }
   0xa   : > { %s438_s15 = scalar_select %p22_p1, %s382_s8, %s24_s13  }
   0xb   : > { %p440_p5 = por %p32_p2, %p31_p0  ;;  %p444_p6 = por %p38_p4, %p37_p3 }
   0xc   : > { %p61_p7 = scmp.eq.s32.totalorder %s422_s10, 1  ;;  %p67_p8 = scmp.eq.s32.totalorder %s226_s11, 1 }
   0xd   : > { %p254_p10 = scmp.lt.s32.totalorder %s386_s9, 2  ;;  %s87_s20 = sand.u32 1, %s382_s8  }
   0xe   : > { %p451_p11 = por %p61_p7, %p31_p0  ;;  %p455_p12 = por %p67_p8, %p37_p3 }
   0xf   : > { %s240_s21 = sshll.u32 %s386_s9, 7  ;;  %s229_s22 = sshll.u32 %s87_s20, 3 }
  0x10   : > { %s568_s18 = scalar_select %p451_p11, 1, 0 }
  0x11   : > { %s569_s19 = scalar_select %p455_p12, 1, 0 }
  0x12   : > { %s464_s25 = scalar_lea.hbm %s563_s0, %s240_s21  ;;  %s91_s26 = scalar_lea.vmem [#allocation2], %s229_s22 }
  0x13   : > { %s99_s27 = sshll.u32 %s91_s26, 4  ;;  %p468_p13 = pnand %p254_p10, %p440_p5  ;;  %s472_s27 = int_to_ptr.vmem [resolvable:$true] %s99_s27 }
  0x14   : > { %s88_s29 = scalar_lea.sflag [#allocation3], %s87_s20  ;;  %s290_s30 = scalar_lea.hbm %s464_s25, 128 }
  0x15   : > { %p291_p2 = scmp.ne.s32.totalorder %s464_s25, %s290_s30  ;;  %p292_p3 = pneg %p468_p13 }
  0x16   : > { %s295_s4 = scalar_lea.hbm %s563_s0, 256  ;;  %p296_p5 = scmp.lt.u32.totalorder %s464_s25, %s563_s0 }
  0x17   : > { %p293_p4 = pnand %p292_p3, %p291_p2  ;;  %p297_p8 = scmp.lt.u32.totalorder %s295_s4, %s290_s30 }
  0x18   : > { %p299_p9 = scmp.lt.u32.totalorder %s290_s30, %s464_s25 }
  0x19   : > { %p294_p7 = pneg %p293_p4  ;;  %p298_p10 = por %p297_p8, %p296_p5 }
  0x1b   : > { %p300_p0 = por %p299_p9, %p298_p10 }
  0x1d   : > { %p301_p1 = pnand %p300_p0, %p294_p7 }
  0x1f   : > { %304 = shalt.err (!%p301_p1)
}
  0x20   : > { %s305_s13 = scalar_lea.vmem %s472_s27, 128  ;;  %s388_s14 = smov [#allocation2]  }
  0x21   : > { %p306_p2 = scmp.ne.s32.totalorder %s472_s27, %s305_s13  ;;  %s310_s16 = sshll.u32 %s388_s14, 4  ;;  %s311_s16 = int_to_ptr.vmem [resolvable:$false] %s310_s16 }
  0x22   : > { %s312_s20 = scalar_lea.vmem %s311_s16, 256  ;;  %p313_p11 = scmp.lt.s32.totalorder %s472_s27, %s311_s16 }
  0x23   : > { %p308_p4 = pnand %p306_p2, %p292_p3  ;;  %p314_p5 = scmp.lt.s32.totalorder %s312_s20, %s305_s13 }
  0x25   : > { %p309_p12 = pneg %p308_p4  ;;  %p315_p8 = por %p314_p5, %p313_p11 }
  0x27   : > { %p316_p9 = pnand %p315_p8, %p309_p12 }
  0x29   : > { %319 = shalt.err (!%p316_p9)
}
  0x2a   : > { %249 = dma.hbm_to_vmem [thread:$0]  (!%p468_p13), %s464_s25, 128, %s472_s27, %s88_s29  }
  0x2b   : > { %p571_p0 = scmp.lt.s32.totalorder %s386_s9, 3  ;;  %p572_p1 = scmp.ge.s32.totalorder %s386_s9, 1 }
  0x2d   : > { %p105_p3 = pnand %p572_p1, %p571_p0 }
  0x2e   : > { %s506_s21 = sand.u32 (!%p105_p3), 1, %s378_s7  }
  0x2f   : > { %108 = sbr.rel (%p105_p3) target bundleno = 81 (0x51), region = 24  ;;  %s233_s22 = sshll.u32 (!%p105_p3), %s506_s21, 3 }
  0x30   : > { %s111_s23 = scalar_lea.sflag (!%p105_p3), [#allocation3], %s506_s21  ;;  %s114_s24 = scalar_lea.vmem (!%p105_p3), [#allocation2], %s233_s22 }
  0x36   : > { %365 = dma.done.wait (%p444_p6), %s111_s23, 128  }
  0x37   : > { %367 = vsyncadd (%p444_p6), %s111_s23, 4294967168  ;;  %s234_s25 = sshll.u32 %s506_s21, 4  ;;  %v389_v0 = vmov 0.0   ;;  %s241_s28 = sshll.u32 %s422_s10, 8  ;;  %v133_v1 = vld [vmem:[%s114_s24] sm:$0xff] }
  0x38   : > { %s132_s26 = scalar_lea.vmem [#allocation5], %s234_s25  ;;  %v135_v2 = vcombine.high %v133_v1, %v133_v1  ;;  %s521_s17 = scalar_lea.hbm %s564_s1, %s241_s28 }
  0x39   : > { %139 = vst [vmem:[%s132_s26] sm:$0xf0] %v389_v0  ;;  %140 = vst [vmem:[%s132_s26 + $0x8] sm:$0xf0] %v389_v0  ;;  %s156_s27 = sshll.u32 %s132_s26, 4  ;;  %s142_s2 = scalar_lea.sflag [#allocation4], %s506_s21  ;;  %s516_s27 = int_to_ptr.vmem [resolvable:$true] %s156_s27 }
  0x3a   : > { %137 = vst [vmem:[%s132_s26] sm:$0xf] %v133_v1  ;;  %138 = vst [vmem:[%s132_s26 + $0x8] sm:$0xf] %v135_v2  ;;  %s320_s3 = scalar_lea.vmem %s516_s27, 256  ;;  %p573_p11 = scmp.ne.s32.totalorder %s568_s18, 0 }
  0x3b   : > { %p321_p6 = scmp.ne.s32.totalorder %s516_s27, %s320_s3  ;;  %s390_s10 = smov [#allocation5]  }
  0x3c   : > { %s324_s4 = sshll.u32 %s390_s10, 4  ;;  %s325_s4 = int_to_ptr.vmem [resolvable:$false] %s324_s4 }
  0x3d   : > { %p322_p12 = pnand %p321_p6, %p573_p11  ;;  %s326_s5 = scalar_lea.vmem %s325_s4, 512 }
  0x3e   : > { %p327_p7 = scmp.lt.s32.totalorder %s516_s27, %s325_s4  ;;  %p328_p10 = scmp.lt.s32.totalorder %s326_s5, %s320_s3 }
  0x3f   : > { %p323_p13 = pneg %p322_p12 }
  0x40   : > { %p329_p2 = por %p328_p10, %p327_p7 }
  0x42   : > { %p330_p4 = pnand %p329_p2, %p323_p13 }
  0x44   : > { %333 = shalt.err (!%p330_p4)
}
  0x45   : > { %s334_s11 = scalar_lea.hbm %s521_s17, 256  ;;  %s338_s16 = scalar_lea.hbm %s564_s1, 512 }
  0x46   : > { %p335_p5 = scmp.ne.s32.totalorder %s521_s17, %s334_s11  ;;  %p339_p0 = scmp.lt.u32.totalorder %s521_s17, %s564_s1 }
  0x47   : > { %p340_p1 = scmp.lt.u32.totalorder %s338_s16, %s334_s11  ;;  %p342_p6 = scmp.lt.u32.totalorder %s334_s11, %s521_s17 }
  0x48   : > { %p336_p8 = pnand %p335_p5, %p573_p11 }
  0x49   : > { %p341_p3 = por %p340_p1, %p339_p0 }
  0x4a   : > { %p337_p9 = pneg %p336_p8 }
  0x4b   : > { %p343_p12 = por %p342_p6, %p341_p3 }
  0x4d   : > { %p344_p13 = pnand %p343_p12, %p337_p9 }
  0x4f   : > { %347 = shalt.err (!%p344_p13)
}
  0x50   : > { %244 = dma.vmem_to_hbm [thread:$0]  (%p573_p11), %s516_s27, 256, %s521_s17, %s142_s2  }
  0x51 PF: > { %s168_s22 = sand.u32 1, %s374_s6   ;;  %p574_p7 = scmp.ne.s32.totalorder %s569_s19, 0 }
  0x52   : > { %p575_p10 = scmp.ge.s32.totalorder %s386_s9, 2  ;;  %s169_s23 = scalar_lea.sflag [#allocation4], %s168_s22 }
  0x54   : > { %p251_p2 = pnand %p575_p10, %p574_p7 }
  0x56   : > { %369 = dma.done.wait (!%p251_p2), %s169_s23, 256  }
  0x57   : > { %371 = vsyncadd (!%p251_p2), %s169_s23, 4294967040  ;;  %p14_p4 = scmp.ge.s32.totalorder %s426_s12, 4   ;;  %s576_s6 = smov %s378_s7 }
  0x58   : > { %s577_s7 = smov %s382_s8  ;;  %s578_s8 = smov %s438_s15 }
  0x59   : > { %s579_s9 = smov %s426_s12  ;;  %16 = sbr.rel (!%p14_p4) target bundleno = 5 (0x5), region = 69 }
  0x60   :  { %174 = vsyncpa [#allocation3], 1 }
  0x61   :  { %176 = vsyncpa [#allocation3 + $0x1], 1 }
  0x62   :  { %177 = vsyncpa [#allocation4], 1 }
  0x63   :  { %179 = vsyncpa [#allocation4 + $0x1], 1 }

</bundles_post_ra>
